<compile_context>
chip_gen: v5e
topology: v5e:2x2
jax: 0.10.0
libtpu: 0.0.40
codegen_flags: <defaults>
</compile_context>

<pallas_src>
import functools

import jax
import jax.numpy as jnp
import numpy as np
from jax import lax
from jax.experimental import pallas as pl
from jax.experimental.pallas import tpu as pltpu


def _round_up(x, m):
    return (x + m - 1) // m * m


def _vmem_capacity_bytes():
    """Per-TensorCore VMEM capacity; conservative (v7x) fallback if unknown."""
    try:
        info = pltpu.get_tpu_info()
        for attr in ("vmem_capacity_bytes", "vmem_size_bytes"):
            cap = getattr(info, attr, None)
            if cap:
                return int(cap)
    except Exception:
        pass
    return 64 << 20


# ---------------------------------------------------------------------------
# Pallas kernel: fused conv3x3/s2 (+bias+ReLU) backbone tail + Linear proj
# ---------------------------------------------------------------------------
def hybrid_embed_kernel(rpe_ref, rpo_ref, wc_ref, bc_ref, wp_ref, bp_ref, o_ref,
                        *, wo, ts, n_sub):
    """One grid step = one (image, band of th = ts*n_sub output rows).

    rpe_ref: ((Ho+1)*Wo, Kr) bf16  even-input-row patches of this image
    rpo_ref: (Ho*Wo, Kr)     bf16  odd-input-row patches of this image
    wc_ref : (3, Kr, Cfp)    bf16  conv weight, one (Kr, Cfp) slab per tap row
    bc_ref : (1, Cfp)        f32   conv bias   (padded cols are zero)
    wp_ref : (Cfp, Ep)       bf16  proj weight (transposed torch Linear)
    bp_ref : (1, Ep)         f32   proj bias   (padded cols are zero)
    o_ref  : (th*Wo, Ep)           output band
    """
    band = pl.program_id(1)
    ho0 = band * (ts * n_sub)            # first output row of this band

    # Small resident operands, hoisted out of the sub-tile loop.
    wc0 = wc_ref[0]
    wc1 = wc_ref[1]
    wc2 = wc_ref[2]
    bc = bc_ref[...]
    bp = bp_ref[...]

    def sub_tile(s, carry):
        ho = ho0 + s * ts                # first output row of this sub-tile
        r0 = ho * wo                     # row offset into flattened row patches
        o0 = s * ts * wo                 # row offset into the output band
        if wo % 8 == 0:                  # sublane-aligned dynamic slices
            r0 = pl.multiple_of(r0, 8)
            o0 = pl.multiple_of(o0, 8)
        n = ts * wo
        # 3x3 / stride-2 conv == three row-tap matmuls over kw*Cin, f32 accum.
        x0 = rpe_ref[pl.ds(r0, n), :]          # tap di=0: input rows 2*ho
        x1 = rpo_ref[pl.ds(r0, n), :]          # tap di=1: input rows 2*ho+1
        x2 = rpe_ref[pl.ds(r0 + wo, n), :]     # tap di=2: input rows 2*ho+2
        feat = jnp.dot(x0, wc0, preferred_element_type=jnp.float32)
        feat += jnp.dot(x1, wc1, preferred_element_type=jnp.float32)
        feat += jnp.dot(x2, wc2, preferred_element_type=jnp.float32)
        feat = jnp.maximum(feat + bc, 0.0)     # conv bias + backbone ReLU (f32)
        feat = feat.astype(wp_ref.dtype)       # bf16 feed for the proj matmul
        out = jnp.dot(feat, wp_ref[...], preferred_element_type=jnp.float32)
        out = out + bp
        o_ref[pl.ds(o0, n), :] = out.astype(o_ref.dtype)
        return carry

    lax.fori_loop(0, n_sub, sub_tile, 0, unroll=True)


# ---------------------------------------------------------------------------
# Wrapper
# ---------------------------------------------------------------------------
def hybrid_embed(x, conv_w, conv_b, proj_w, proj_b, *, stride=2, pad=1,
                 out_dtype=jnp.bfloat16):
    """Forward pass of HybridEmbed with a 1-conv synthetic backbone.

    x:       (B, Cin, H, W)    NCHW float32
    conv_w:  (Cf, Cin, 3, 3)   backbone Conv2d weight (torch OIHW layout)
    conv_b:  (Cf,)
    proj_w:  (E, Cf)           nn.Linear weight (torch layout)
    proj_b:  (E,)
    returns: (B, num_patches, E)
    """
    B, Cin, H, W = x.shape
    Cf, _, kh, kw = conv_w.shape
    E = proj_w.shape[0]
    # TODO(synk): the real HybridEmbed wraps an arbitrary pretrained CNN; this
    # kernel implements the synthetic Conv2d(k=3, s=2, p=1) + ReLU backbone used
    # as backbone(x)[-1].  Other (k, stride, pad) need a different row-phase split.
    assert (kh, kw, stride, pad) == (3, 3, 2, 1), "kernel specialised to 3x3/s2/p1"

    Ho = (H + 2 * pad - kh) // stride + 1
    Wo = (W + 2 * pad - kw) // stride + 1
    Kr = kw * Cin                      # contraction depth of one tap-row matmul
    Cfp = _round_up(Cf, 128)           # lane-dense feature dim
    Ep = _round_up(E, 128)             # lane-dense embed dim
    out_el = jnp.dtype(out_dtype).itemsize

    # ---- wrapper-side prep: bf16 row patches (~1.5x raw image) + weights ----
    # rp[b, r, wo, dj*Cin + c] = x_pad[b, c, r, stride*wo + dj]
    xb = x.astype(jnp.bfloat16)                        # cast BEFORE pad/stack chain
    xp = jnp.pad(xb, ((0, 0), (0, 0), (pad, pad), (pad, pad)))
    cols = jnp.stack(
        [xp[:, :, :, dj:dj + stride * Wo:stride] for dj in range(kw)], axis=0)
    rp = cols.transpose(1, 3, 4, 0, 2).reshape(B, H + 2 * pad, Wo, Kr)
    # Even/odd input-row phases: output row ho uses even rows {ho, ho+1}
    # (taps di=0,2) and odd row {ho} (tap di=1) -> every tap is contiguous.
    rp_even = rp[:, 0:2 * Ho + 1:2].reshape(B, (Ho + 1) * Wo, Kr)
    rp_odd = rp[:, 1:2 * Ho:2].reshape(B, Ho * Wo, Kr)

    # Conv weight as one (Kr, Cfp) slab per tap row: wc[di, dj*Cin + c, f].
    wc = conv_w.transpose(2, 3, 1, 0).reshape(kh, Kr, Cf)
    wc = jnp.pad(wc, ((0, 0), (0, 0), (0, Cfp - Cf))).astype(jnp.bfloat16)
    bc = jnp.pad(conv_b.reshape(1, Cf), ((0, 0), (0, Cfp - Cf))).astype(jnp.float32)
    wp = jnp.pad(proj_w.T, ((0, Cfp - Cf), (0, Ep - E))).astype(jnp.bfloat16)
    bp = jnp.pad(proj_b.reshape(1, E), ((0, 0), (0, Ep - E))).astype(jnp.float32)

    # ---- generation-aware tiling --------------------------------------------
    vmem_cap = _vmem_capacity_bytes()                      # 64 MiB v7x, 128 MiB v5e/v6e
    vmem_limit = int(min(vmem_cap - (8 << 20), 96 << 20))  # ~56 MiB v7x, 96 MiB v5e/v6e
    resident = wc.size * 2 + wp.size * 2 + (bc.size + bp.size) * 4
    rp_bytes = 2 * (rp_even.size + rp_odd.size) * 2        # double-buffered bf16 inputs
    budget = max(vmem_limit - resident - rp_bytes, 4 << 20)
    # th: output rows per grid step (double-buffered store block + f32 temps).
    per_row = Wo * (2 * Ep * out_el + 6 * Cfp + 4 * Ep + 6 * Kr)
    th_cap = max(1, (budget // 2) // per_row)
    divisors = [d for d in range(1, Ho + 1) if Ho % d == 0]
    cand = [d for d in divisors if d <= th_cap and (d * Wo) % 8 == 0]
    th = max(cand) if cand else Ho                         # th == Ho always legal (full block)
    n_bands = Ho // th
    # ts: rows per in-kernel sub-tile (bounds the live f32 intermediate ~<=2 MiB).
    ts_cap = max(1, (2 << 20) // (Wo * Cfp * 4))
    n_sub = next(k for k in range(1, th + 1) if th % k == 0 and th // k <= ts_cap)
    ts = th // n_sub

    grid = (B, n_bands)
    cost = pl.CostEstimate(
        flops=int(2 * B * Ho * Wo * (kh * Kr * Cfp + Cfp * Ep)),
        transcendentals=0,
        bytes_accessed=int((rp_even.size + rp_odd.size) * 2 + wc.size * 2
                           + wp.size * 2 + (bc.size + bp.size) * 4
                           + B * Ho * Wo * Ep * out_el),
    )

    kernel = functools.partial(hybrid_embed_kernel, wo=Wo, ts=ts, n_sub=n_sub)
    resident_spec = pl.BlockSpec(memory_space=pltpu.MemorySpace.VMEM)  # single-buffered

    out = pl.pallas_call(
        kernel,
        out_shape=jax.ShapeDtypeStruct((B, Ho * Wo, Ep), out_dtype),
        grid_spec=pltpu.PrefetchScalarGridSpec(
            num_scalar_prefetch=0,
            grid=grid,
            in_specs=[
                # Per-image row patches: whole image resident, re-fetched only
                # when the batch index changes (double-buffered -> image b+1
                # prefetch overlaps the last band of image b).
                pl.BlockSpec((None, (Ho + 1) * Wo, Kr), lambda b, i: (b, 0, 0)),
                pl.BlockSpec((None, Ho * Wo, Kr), lambda b, i: (b, 0, 0)),
                # Constant-index weights/biases: whole-array VMEM residents.
                resident_spec,   # wc
                resident_spec,   # bc
                resident_spec,   # wp
                resident_spec,   # bp
            ],
            out_specs=pl.BlockSpec((None, th * Wo, Ep), lambda b, i: (b, i, 0)),
        ),
        compiler_params=pltpu.CompilerParams(
            dimension_semantics=("parallel", "parallel"),
            vmem_limit_bytes=vmem_limit,
        ),
        cost_estimate=cost,
    )(rp_even, rp_odd, wc, bc, wp, bp)

    return out[:, :, :E]


# ---------------------------------------------------------------------------
# Pure-JAX reference (mirrors the PyTorch forward semantics)
# ---------------------------------------------------------------------------
def hybrid_embed_ref(x, conv_w, conv_b, proj_w, proj_b, *, stride=2, pad=1):
    feat = jax.lax.conv_general_dilated(
        x, conv_w, window_strides=(stride, stride),
        padding=((pad, pad), (pad, pad)),
        dimension_numbers=("NCHW", "OIHW", "NCHW"))
    feat = feat + conv_b[None, :, None, None]
    feat = jnp.maximum(feat, 0.0)                            # backbone(x)[-1]
    B, Cf, Ho, Wo = feat.shape
    seq = feat.reshape(B, Cf, Ho * Wo).transpose(0, 2, 1)    # flatten(2).transpose(1,2)
    return seq @ proj_w.T + proj_b                           # self.proj


if __name__ == "__main__":
    # Small shapes consistent with the module: B=2, in_chans=4, img=16x16,
    # backbone feature_dim=32 at stride 2 -> feature_size 8x8 (num_patches=64),
    # embed_dim=32.
    B, Cin, Himg, Wimg = 2, 4, 16, 16
    Cf, E, k = 32, 32, 3

    key = jax.random.PRNGKey(0)
    kx, kcw, kcb, kpw, kpb = jax.random.split(key, 5)
    x = jax.random.normal(kx, (B, Cin, Himg, Wimg), dtype=jnp.float32)
    conv_w = jax.random.normal(kcw, (Cf, Cin, k, k), dtype=jnp.float32) * 0.1
    conv_b = jax.random.normal(kcb, (Cf,), dtype=jnp.float32) * 0.1
    proj_w = jax.random.normal(kpw, (E, Cf), dtype=jnp.float32) * 0.1
    proj_b = jax.random.normal(kpb, (E,), dtype=jnp.float32) * 0.1

    out = hybrid_embed(x, conv_w, conv_b, proj_w, proj_b)
    out = jax.block_until_ready(out)

    ref = hybrid_embed_ref(x, conv_w, conv_b, proj_w, proj_b)
    # bf16 MXU operands / bf16 output with f32 accumulation -> loose tolerance.
    np.testing.assert_allclose(np.asarray(out.astype(jnp.float32)),
                               np.asarray(ref), rtol=3e-2, atol=3e-2)
    assert out.shape == (B, 8 * 8, E)

    print("KERNEL_OK")
</pallas_src>

<mosaic_0001>
module attributes {stable_mosaic.version = 11 : i64} {
  func.func @hybrid_embed_kernel(%arg0: i32, %arg1: i32, %arg2: memref<1x72x12xbf16, #tpu.memory_space<vmem>>, %arg3: memref<1x64x12xbf16, #tpu.memory_space<vmem>>, %arg4: memref<3x12x128xbf16, #tpu.memory_space<vmem>>, %arg5: memref<1x128xf32, #tpu.memory_space<vmem>>, %arg6: memref<128x128xbf16, #tpu.memory_space<vmem>>, %arg7: memref<1x128xf32, #tpu.memory_space<vmem>>, %arg8: memref<1x64x128xbf16, #tpu.memory_space<vmem>>) attributes {dimension_semantics = [#tpu.dimension_semantics<parallel>, #tpu.dimension_semantics<parallel>], iteration_bounds = array<i64: 2, 1>, scalar_prefetch = 0 : i64, scratch_operands = 0 : i64, tpu.core_type = #tpu.core_type<tc>, window_params = [{transform_indices = @transform_0, window_bounds = array<i64: 1, 72, 12>}, {transform_indices = @transform_1, window_bounds = array<i64: 1, 64, 12>}, {pipeline_mode = #tpu.pipeline_mode<synchronous>, transform_indices = @transform_2, window_bounds = array<i64: 3, 12, 128>}, {pipeline_mode = #tpu.pipeline_mode<synchronous>, transform_indices = @transform_3, window_bounds = array<i64: 1, 128>}, {pipeline_mode = #tpu.pipeline_mode<synchronous>, transform_indices = @transform_4, window_bounds = array<i64: 128, 128>}, {pipeline_mode = #tpu.pipeline_mode<synchronous>, transform_indices = @transform_5, window_bounds = array<i64: 1, 128>}, {transform_indices = @transform_6, window_bounds = array<i64: 1, 64, 128>}]} {
    %c8_i32 = arith.constant 8 : i32
    %0 = arith.muli %arg1, %c8_i32 : i32
    %c0 = arith.constant 0 : index
    %c0_0 = arith.constant 0 : index
    %c0_1 = arith.constant 0 : index
    %1 = vector.load %arg4[%c0, %c0_0, %c0_1] : memref<3x12x128xbf16, #tpu.memory_space<vmem>>, vector<1x12x128xbf16>
    %2 = vector.shape_cast %1 : vector<1x12x128xbf16> to vector<12x128xbf16>
    %c1 = arith.constant 1 : index
    %c0_2 = arith.constant 0 : index
    %c0_3 = arith.constant 0 : index
    %3 = vector.load %arg4[%c1, %c0_2, %c0_3] : memref<3x12x128xbf16, #tpu.memory_space<vmem>>, vector<1x12x128xbf16>
    %4 = vector.shape_cast %3 : vector<1x12x128xbf16> to vector<12x128xbf16>
    %c2 = arith.constant 2 : index
    %c0_4 = arith.constant 0 : index
    %c0_5 = arith.constant 0 : index
    %5 = vector.load %arg4[%c2, %c0_4, %c0_5] : memref<3x12x128xbf16, #tpu.memory_space<vmem>>, vector<1x12x128xbf16>
    %6 = vector.shape_cast %5 : vector<1x12x128xbf16> to vector<12x128xbf16>
    %c0_6 = arith.constant 0 : index
    %c0_7 = arith.constant 0 : index
    %7 = vector.load %arg5[%c0_6, %c0_7] : memref<1x128xf32, #tpu.memory_space<vmem>>, vector<1x128xf32>
    %c0_8 = arith.constant 0 : index
    %c0_9 = arith.constant 0 : index
    %8 = vector.load %arg7[%c0_8, %c0_9] : memref<1x128xf32, #tpu.memory_space<vmem>>, vector<1x128xf32>
    %c0_i32 = arith.constant 0 : i32
    %c8_i32_10 = arith.constant 8 : i32
    %9 = arith.muli %c0_i32, %c8_i32_10 : i32
    %10 = arith.addi %0, %9 : i32
    %c8_i32_11 = arith.constant 8 : i32
    %11 = arith.muli %10, %c8_i32_11 : i32
    %c8_i32_12 = arith.constant 8 : i32
    %12 = arith.muli %c0_i32, %c8_i32_12 : i32
    %c8_i32_13 = arith.constant 8 : i32
    %13 = arith.muli %12, %c8_i32_13 : i32
    %14 = tpu.assume_multiple %11, 8 : i32
    %15 = tpu.assume_multiple %13, 8 : i32
    %c0_14 = arith.constant 0 : index
    %16 = arith.index_cast %14 : i32 to index
    %c0_15 = arith.constant 0 : index
    %17 = vector.load %arg2[%c0_14, %16, %c0_15] : memref<1x72x12xbf16, #tpu.memory_space<vmem>>, vector<1x64x12xbf16>
    %18 = vector.shape_cast %17 : vector<1x64x12xbf16> to vector<64x12xbf16>
    %c0_16 = arith.constant 0 : index
    %19 = arith.index_cast %14 : i32 to index
    %c0_17 = arith.constant 0 : index
    %20 = vector.load %arg3[%c0_16, %19, %c0_17] : memref<1x64x12xbf16, #tpu.memory_space<vmem>>, vector<1x64x12xbf16>
    %21 = vector.shape_cast %20 : vector<1x64x12xbf16> to vector<64x12xbf16>
    %c8_i32_18 = arith.constant 8 : i32
    %22 = arith.addi %14, %c8_i32_18 : i32
    %c0_19 = arith.constant 0 : index
    %23 = arith.index_cast %22 : i32 to index
    %c0_20 = arith.constant 0 : index
    %24 = vector.load %arg2[%c0_19, %23, %c0_20] : memref<1x72x12xbf16, #tpu.memory_space<vmem>>, vector<1x64x12xbf16>
    %25 = vector.shape_cast %24 : vector<1x64x12xbf16> to vector<64x12xbf16>
    %cst = arith.constant dense<0.000000e+00> : vector<64x128xf32>
    %26 = tpu.matmul %18, %2, %cst {dimension_numbers = #tpu.dot_dimension_numbers<[1], [0], [0], [1], [0, 0, 1, 1], [], []>} : vector<64x12xbf16>, vector<12x128xbf16>, vector<64x128xf32> -> vector<64x128xf32>
    %cst_21 = arith.constant dense<0.000000e+00> : vector<64x128xf32>
    %27 = tpu.matmul %21, %4, %cst_21 {dimension_numbers = #tpu.dot_dimension_numbers<[1], [0], [0], [1], [0, 0, 1, 1], [], []>} : vector<64x12xbf16>, vector<12x128xbf16>, vector<64x128xf32> -> vector<64x128xf32>
    %28 = arith.addf %26, %27 : vector<64x128xf32>
    %cst_22 = arith.constant dense<0.000000e+00> : vector<64x128xf32>
    %29 = tpu.matmul %25, %6, %cst_22 {dimension_numbers = #tpu.dot_dimension_numbers<[1], [0], [0], [1], [0, 0, 1, 1], [], []>} : vector<64x12xbf16>, vector<12x128xbf16>, vector<64x128xf32> -> vector<64x128xf32>
    %30 = arith.addf %28, %29 : vector<64x128xf32>
    %31 = vector.broadcast %7 : vector<1x128xf32> to vector<64x128xf32>
    %32 = arith.addf %30, %31 : vector<64x128xf32>
    %cst_23 = arith.constant 0.000000e+00 : f32
    %33 = vector.broadcast %cst_23 : f32 to vector<64x128xf32>
    %34 = arith.maximumf %32, %33 : vector<64x128xf32>
    %35 = arith.truncf %34 : vector<64x128xf32> to vector<64x128xbf16>
    %c0_24 = arith.constant 0 : index
    %c0_25 = arith.constant 0 : index
    %36 = vector.load %arg6[%c0_24, %c0_25] : memref<128x128xbf16, #tpu.memory_space<vmem>>, vector<128x128xbf16>
    %cst_26 = arith.constant dense<0.000000e+00> : vector<64x128xf32>
    %37 = tpu.matmul %35, %36, %cst_26 {dimension_numbers = #tpu.dot_dimension_numbers<[1], [0], [0], [1], [0, 0, 1, 1], [], []>} : vector<64x128xbf16>, vector<128x128xbf16>, vector<64x128xf32> -> vector<64x128xf32>
    %38 = vector.broadcast %8 : vector<1x128xf32> to vector<64x128xf32>
    %39 = arith.addf %37, %38 : vector<64x128xf32>
    %40 = arith.truncf %39 : vector<64x128xf32> to vector<64x128xbf16>
    %c0_27 = arith.constant 0 : index
    %41 = arith.index_cast %15 : i32 to index
    %c0_28 = arith.constant 0 : index
    %42 = vector.load %arg8[%c0_27, %41, %c0_28] : memref<1x64x128xbf16, #tpu.memory_space<vmem>>, vector<1x64x128xbf16>
    %43 = vector.shape_cast %42 : vector<1x64x128xbf16> to vector<64x128xbf16>
    %44 = vector.shape_cast %40 : vector<64x128xbf16> to vector<1x64x128xbf16>
    tpu.vector_store %arg8[%c0_27, %41, %c0_28], %44 {strides = array<i32>} : memref<1x64x128xbf16, #tpu.memory_space<vmem>>, vector<1x64x128xbf16>,
    %c1_i32 = arith.constant 1 : i32
    return
  }
  func.func @transform_0(%arg0: i32, %arg1: i32) -> (i32, i32, i32) {
    %c0_i32 = arith.constant 0 : i32
    %c0_i32_0 = arith.constant 0 : i32
    %c0_i32_1 = arith.constant 0 : i32
    return %arg0, %c0_i32, %c0_i32_0 : i32, i32, i32
  }
  func.func @transform_1(%arg0: i32, %arg1: i32) -> (i32, i32, i32) {
    %c0_i32 = arith.constant 0 : i32
    %c0_i32_0 = arith.constant 0 : i32
    %c0_i32_1 = arith.constant 0 : i32
    return %arg0, %c0_i32, %c0_i32_0 : i32, i32, i32
  }
  func.func @transform_2(%arg0: i32, %arg1: i32) -> (i32, i32, i32) {
    %c0_i32 = arith.constant 0 : i32
    %c0_i32_0 = arith.constant 0 : i32
    %c0_i32_1 = arith.constant 0 : i32
    %c0_i32_2 = arith.constant 0 : i32
    return %c0_i32, %c0_i32_0, %c0_i32_1 : i32, i32, i32
  }
  func.func @transform_3(%arg0: i32, %arg1: i32) -> (i32, i32) {
    %c0_i32 = arith.constant 0 : i32
    %c0_i32_0 = arith.constant 0 : i32
    %c0_i32_1 = arith.constant 0 : i32
    return %c0_i32, %c0_i32_0 : i32, i32
  }
  func.func @transform_4(%arg0: i32, %arg1: i32) -> (i32, i32) {
    %c0_i32 = arith.constant 0 : i32
    %c0_i32_0 = arith.constant 0 : i32
    %c0_i32_1 = arith.constant 0 : i32
    return %c0_i32, %c0_i32_0 : i32, i32
  }
  func.func @transform_5(%arg0: i32, %arg1: i32) -> (i32, i32) {
    %c0_i32 = arith.constant 0 : i32
    %c0_i32_0 = arith.constant 0 : i32
    %c0_i32_1 = arith.constant 0 : i32
    return %c0_i32, %c0_i32_0 : i32, i32
  }
  func.func @transform_6(%arg0: i32, %arg1: i32) -> (i32, i32, i32) {
    %c0_i32 = arith.constant 0 : i32
    %c0_i32_0 = arith.constant 0 : i32
    return %arg0, %arg1, %c0_i32 : i32, i32, i32
  }
}

</mosaic_0001>

<bundles_post_ra>
// kernel: tpu_custom_call.1
= control target key start
LH: loop header
LB: loop body
LE: loop exit
PB: predicated region body
PF: predicated region fallthrough
CT: control target
= control target key end

     0   :  { %11 = vsyncpa [#allocation3], 0  ;;  %s1323_s0 = inlined_call_operand.vmem [shape: bf16[2,72,12], index: 0, kind: input, shape index: {}]   ;;  %s1324_s1 = inlined_call_operand.vmem [shape: bf16[2,64,12], index: 1, kind: input, shape index: {}]   ;;  %s1325_s2 = inlined_call_operand.vmem [shape: bf16[3,12,128], index: 2, kind: input, shape index: {}]   ;;  %s1326_s3 = inlined_call_operand.vmem [shape: f32[1,128], index: 3, kind: input, shape index: {}]   ;;  %s1327_s4 = inlined_call_operand.vmem [shape: bf16[128,128], index: 4, kind: input, shape index: {}]   ;;  %s1328_s5 = inlined_call_operand.vmem [shape: f32[1,128], index: 5, kind: input, shape index: {}]   ;;  %s1329_s6 = inlined_call_operand.hbm [shape: bf16[2,64,128], index: 6, kind: output, shape index: {}]  }
   0x1   :  { %13 = vsyncpa [#allocation3 + $0x1], 0  ;;  %s1156_s21 = smov 0   ;;  %s1158_s22 = smov 0  }
   0x2   :  { %s1160_s23 = smov 0   ;;  %s1162_s24 = smov 0  }
   0x3   :  { %s1164_s25 = smov 0   ;;  %s1166_s26 = smov 0  }
   0x4 LB: > { %s793_s27 = sadd.s32 4294967295, %s1117_s26   ;;  %s794_s28 = sadd.s32 4294967294, %s1117_s26   ;;  %s1117_s26 = sphi %s1166_s26, %s19_s26   ;;  %s1113_s25 = sphi %s1164_s25, %s1336_s25   ;;  %s1109_s24 = sphi %s1162_s24, %s1335_s24   ;;  %s1105_s23 = sphi %s1160_s23, %s1334_s23   ;;  %s1101_s22 = sphi %s1158_s22, %s1333_s22   ;;  %s1097_s21 = sphi %s1156_s21, %s1332_s21  }
   0x5   : > { %s31_s29 = sadd.s32 1, %s1113_s25  ;;  %s176_s30 = sadd.s32 1, %s1105_s23 }
   0x6   : > { %p33_p0 = scmp.ge.s32.totalorder %s31_s29, 2  ;;  %p186_p1 = scmp.ne.s32.totalorder %s1105_s23, %s1101_s22 }
   0x7   : > { %p187_p2 = scmp.eq.s32.totalorder %s793_s27, 1  ;;  %p192_p3 = scmp.ne.s32.totalorder %s1101_s22, %s1097_s21 }
   0x8   : > { %s1338_s29 = smov (%p33_p0, %s31_s29), 0  ;;  %p193_p5 = scmp.eq.s32.totalorder %s794_s28, 1 }
   0x9   : > { %p1196_p4 = por %p187_p2, %p186_p1  ;;  %s171_s8 = ssub.s32 %s1113_s25, %s1338_s29 }
   0xa   : > { %p797_p6 = scmp.ge.s32.totalorder %s1117_s26, 1  ;;  %p174_p7 = scmp.eq.s32.totalorder %s171_s8, 0 }
   0xb   : > { %p1203_p8 = por %p193_p5, %p192_p3  ;;  %p239_p9 = scmp.lt.s32.totalorder %s1117_s26, 3 }
   0xc   : > { %s1209_s10 = scalar_select %p174_p7, %s1105_s23, %s176_s30  }
   0xd   : > { %p240_p10 = pnand %p797_p6, %p239_p9 }
   0xe   : > { %p274_p11 = scmp.lt.s32.totalorder (!%p240_p10), %s1109_s24, 1  ;;  %s271_s28 = sand.u32 (!%p240_p10), 1, %s1101_s22  }
   0xf   : > { %243 = sbr.rel (%p240_p10) target bundleno = 373 (0x175), region = 44  ;;  %s947_s13 = sshll.u32 (!%p240_p10), %s1109_s24, 5 }
  0x10   : > { %s698_s16 = scalar_lea.hbm (!%p240_p10), %s1329_s6, %s947_s13  ;;  %s685_s19 = scalar_lea.sflag (!%p240_p10), [#allocation3], %s271_s28 }
  0x11   : > { %s701_s18 = sshll.u32 (!%p240_p10), %s698_s16, 4  ;;  %s702_s18 = int_to_ptr.hbm [resolvable:$true] %s701_s18 }
  0x12   : > { %s1053_s20 = sshra.s32 (!%p240_p10), %s702_s18, 4  ;;  %s1054_s20 = int_to_ptr.hbm [resolvable:$true] %s1053_s20 }
  0x13   : > { %s1055_s27 = scalar_lea.hbm (!%p240_p10), %s1054_s20, 32  ;;  %p1060_p1 = scmp.lt.s32.totalorder (!%p240_p10), %s1054_s20, %s1329_s6 }
  0x14   : > { %v832_v0 = vld [vmem:[%s1325_s2 + $0x8] sm:$0xf]  ;;  %v925_v1 = vld [vmem:[%s1325_s2 + $0x8] sm:$0x30]  ;;  %vm370_vm0 = vcmask 1045504   ;;  %s275_s30 = scalar_select %p274_p11, %s1109_s24, 1 }
  0x15   : > { %v833_v2 = vor.u32 %v925_v1, %v832_v0  ;;  %v856_v3 = vld [vmem:[%s1325_s2] sm:$0xf]  ;;  %v924_v4 = vld [vmem:[%s1325_s2] sm:$0x30]  ;;  %v880_v5 = vld [vmem:[%s1325_s2 + $0x10] sm:$0xf]  ;;  %p1056_p12 = scmp.ne.s32.totalorder %s1054_s20, %s1055_s27 }
  0x16   : > { %v857_v6 = vor.u32 %v924_v4, %v856_v3  ;;  %v926_v7 = vld [vmem:[%s1325_s2 + $0x10] sm:$0x30]  ;;  %s979_s8 = smul.u32 36, %s275_s30  ;;  %s923_s11 = sshll.u32 %s275_s30, 5  ;;  %vm357_vm1 = vcmask 97280   ;;  %v946_v18 = vld [vmem:[%s1327_s4 + $0x38] sm:$0xff] }
  0x17   : > { %v372_v8 = vsel %vm370_vm0, %v833_v2, 0  ;;  %v881_v9 = vor.u32 %v926_v7, %v880_v5  ;;  %s283_s14 = scalar_lea.vmem %s1324_s1, %s923_s11  ;;  %v945_v19 = vld [vmem:[%s1327_s4 + $0x30] sm:$0xff]  ;;  %971 = vmatpush.bf16.msra.mxu3 %v946_v18  ;;  %v944_v26 = vld [vmem:[%s1327_s4 + $0x28] sm:$0xff]  ;;  %v943_v27 = vld [vmem:[%s1327_s4 + $0x20] sm:$0xff]  ;;  %s798_s11 = sshll.u32 %s271_s28, 5 }
  0x18   : > { %381 = vmatpush.bf16.msra.mxu0 %v372_v8  ;;  %v441_v10 = vsel %vm370_vm0, %v857_v6, 0  ;;  %s278_s17 = scalar_lea.vmem %s1323_s0, %s979_s8  ;;  %v931_v12 = vld [vmem:[%s283_s14] sm:$0xff]  ;;  %v932_v15 = vld [vmem:[%s283_s14 + $0x8] sm:$0xff]  ;;  %v933_v20 = vld [vmem:[%s283_s14 + $0x10] sm:$0xff]  ;;  %s273_s12 = scalar_lea.vmem [#allocation2], %s798_s11 }
  0x19   : > { %450 = vmatpush.bf16.msra.mxu1 %v441_v10  ;;  %v510_v11 = vsel %vm370_vm0, %v881_v9, 0  ;;  %v927_v13 = vld [vmem:[%s278_s17] sm:$0xff]  ;;  %v928_v16 = vld [vmem:[%s278_s17 + $0x8] sm:$0xff]  ;;  %v929_v21 = vld [vmem:[%s278_s17 + $0x10] sm:$0xff]  ;;  %p1057_p13 = pnand %p1056_p12, %p1196_p4  ;;  %s1059_s8 = scalar_lea.hbm %s1329_s6, 64 }
  0x1a   : > { %519 = vmatpush.bf16.msra.mxu2 %v510_v11  ;;  %v935_v14 = vld [vmem:[%s278_s17 + $0x4] sm:$0xff]  ;;  %v936_v17 = vld [vmem:[%s278_s17 + $0xc] sm:$0xff]  ;;  %v937_v22 = vld [vmem:[%s278_s17 + $0x14] sm:$0xff]  ;;  %p1061_p2 = scmp.lt.s32.totalorder %s1059_s8, %s1055_s27 }
  0x1b   : > { %834 = vmatmul.msk.bf16.vlgmr.msra.gmra.mxu0 %vm357_vm1, %v931_v12  ;;  %972 = vmatpush.bf16.msra.mxu3 %v945_v19  ;;  %v934_v23 = vld [vmem:[%s283_s14 + $0x18] sm:$0xff]  ;;  %v941_v29 = vld [vmem:[%s1327_s4 + $0x10] sm:$0xff]  ;;  %v940_v30 = vld [vmem:[%s1327_s4 + $0x8] sm:$0xff]  ;;  %p1058_p0 = pneg %p1057_p13 }
  0x1c   : > { %858 = vmatmul.msk.bf16.vlgmr.msra.gmra.mxu1 %vm357_vm1, %v927_v13  ;;  %639 = vmatpush.bf16.msrb.mxu0 %v946_v18  ;;  %v930_v24 = vld [vmem:[%s278_s17 + $0x18] sm:$0xff]  ;;  %v939_v31 = vld [vmem:[%s1327_s4] sm:$0xff]  ;;  %p1062_p3 = por %p1061_p2, %p1060_p1 }
  0x1d   : > { %882 = vmatmul.msk.bf16.vlgmr.msra.gmra.mxu2 %vm357_vm1, %v935_v14  ;;  %v938_v25 = vld [vmem:[%s278_s17 + $0x1c] sm:$0xff]  ;;  %s699_s17 = sshll.u32 %s273_s12, 4  ;;  %s700_s17 = int_to_ptr.vmem [resolvable:$true] %s699_s17 }
  0x1e   : > { %v942_v28 = vld [vmem:[%s1327_s4 + $0x18] sm:$0xff]  ;;  %v1037_v39 = vld [vmem:[%s1326_s3] ss:$0 sm:$0xff]  ;;  %p1063_p5 = pnand %p1062_p3, %p1058_p0 }
  0x1f   : > { %973 = vmatpush.bf16.msra.mxu3 %v944_v26 }
  0x20   : > { %640 = vmatpush.bf16.msrb.mxu0 %v945_v19 }
  0x23   : > { %974 = vmatpush.bf16.msra.mxu3 %v943_v27 }
  0x24   : > { %641 = vmatpush.bf16.msrb.mxu0 %v944_v26 }
  0x27   : > { %975 = vmatpush.bf16.msra.mxu3 %v942_v28 }
  0x28   : > { %642 = vmatpush.bf16.msrb.mxu0 %v943_v27 }
  0x2b   : > { %835 = vmatmul.msk.bf16.gmra.mxu0 %vm357_vm1, %v932_v15  ;;  %976 = vmatpush.bf16.msra.mxu3 %v941_v29 }
  0x2c   : > { %859 = vmatmul.msk.bf16.gmra.mxu1 %vm357_vm1, %v928_v16  ;;  %643 = vmatpush.bf16.msrb.mxu0 %v942_v28 }
  0x2d   : > { %883 = vmatmul.msk.bf16.gmra.mxu2 %vm357_vm1, %v936_v17 }
  0x2f   : > { %977 = vmatpush.bf16.msra.mxu3 %v940_v30 }
  0x30   : > { %644 = vmatpush.bf16.msrb.mxu0 %v941_v29 }
  0x33   : > { %978 = vmatpush.bf16.msra.mxu3 %v939_v31 }
  0x34   : > { %645 = vmatpush.bf16.msrb.mxu0 %v940_v30  ;;  %v1038_v30 = vld [vmem:[%s1328_s5] ss:$0 sm:$0xff] }
  0x38   : > { %646 = vmatpush.bf16.msrb.mxu0 %v939_v31 }
  0x3b   : > { %836 = vmatmul.msk.bf16.gmra.mxu0 %vm357_vm1, %v933_v20 }
  0x3c   : > { %860 = vmatmul.msk.bf16.gmra.mxu1 %vm357_vm1, %v929_v21 }
  0x3d   : > { %884 = vmatmul.msk.bf16.gmra.mxu2 %vm357_vm1, %v937_v22 }
  0x4b   : > { %837 = vmatmul.msk.bf16.gmra.mxu0 %vm357_vm1, %v934_v23 }
  0x4c   : > { %861 = vmatmul.msk.bf16.gmra.mxu1 %vm357_vm1, %v930_v24 }
  0x4d   : > { %885 = vmatmul.msk.bf16.gmra.mxu2 %vm357_vm1, %v938_v25 }
  0x98   : > { %v383_v32 = vpop.f32.mrf.mxu0 }
  0x99   : > { %v452_v33 = vpop.f32.mrf.mxu1 }
  0x9a   : > { %v453_v35 = vadd.f32 %v452_v33, %v383_v32 }
  0xa0   : > { %v521_v34 = vpop.f32.mrf.mxu2  ;;  %v385_v36 = vpop.f32.mrf.mxu0 }
  0xa1   : > { %v454_v37 = vpop.f32.mrf.mxu1  ;;  %v541_v38 = vadd.f32 %v521_v34, %v453_v35 }
  0xa2   : > { %v455_v40 = vadd.f32 %v454_v37, %v385_v36 }
  0xa3   : > { %v552_v42 = vadd.f32 %v1037_v39, %v541_v38 }
  0xa5   : > { %v560_v47 = vmax.f32 %v552_v42, 0.0 }
  0xa8   : > { %v523_v41 = vpop.f32.mrf.mxu2  ;;  %v388_v44 = vpop.f32.mrf.mxu0 }
  0xa9   : > { %v542_v43 = vadd.f32 %v523_v41, %v455_v40  ;;  %v457_v45 = vpop.f32.mrf.mxu1 }
  0xaa   : > { %v458_v51 = vadd.f32 %v457_v45, %v388_v44 }
  0xab   : > { %v553_v46 = vadd.f32 %v1037_v39, %v542_v43 }
  0xad   : > { %v561_v48 = vmax.f32 %v553_v46, 0.0 }
  0xaf   : > { %v568_v49 = vpack.c.bf16 %v561_v48, %v560_v47 }
  0xb0   : > { %v526_v50 = vpop.f32.mrf.mxu2  ;;  %v390_v52 = vpop.f32.mrf.mxu0 }
  0xb1   : > { %647 = vmatmul.bf16.vlgmr.msrb.gmra.mxu0 %v568_v49  ;;  %v459_v53 = vpop.f32.mrf.mxu1  ;;  %v543_v54 = vadd.f32 %v526_v50, %v458_v51 }
  0xb2   : > { %v460_v55 = vadd.f32 %v459_v53, %v390_v52 }
  0xb3   : > { %v554_v57 = vadd.f32 %v1037_v39, %v543_v54 }
  0xb5   : > { %v562_v62 = vmax.f32 %v554_v57, 0.0 }
  0xb8   : > { %v528_v56 = vpop.f32.mrf.mxu2  ;;  %v393_v59 = vpop.f32.mrf.mxu0 }
  0xb9   : > { %v544_v58 = vadd.f32 %v528_v56, %v460_v55  ;;  %v462_v60 = vpop.f32.mrf.mxu1 }
  0xba   : > { %v463_v2 = vadd.f32 %v462_v60, %v393_v59 }
  0xbb   : > { %v555_v61 = vadd.f32 %v1037_v39, %v544_v58 }
  0xbd   : > { %v563_v63 = vmax.f32 %v555_v61, 0.0 }
  0xbf   : > { %v569_v0 = vpack.c.bf16 %v563_v63, %v562_v62 }
  0xc0   : > { %v531_v1 = vpop.f32.mrf.mxu2  ;;  %v395_v3 = vpop.f32.mrf.mxu0 }
  0xc1   : > { %652 = vmatmul.bf16.vlgmr.msra.gmra.mxu3 %v569_v0  ;;  %v464_v4 = vpop.f32.mrf.mxu1  ;;  %v545_v5 = vadd.f32 %v531_v1, %v463_v2 }
  0xc2   : > { %v465_v6 = vadd.f32 %v464_v4, %v395_v3 }
  0xc3   : > { %v556_v8 = vadd.f32 %v1037_v39, %v545_v5 }
  0xc5   : > { %v564_v13 = vmax.f32 %v556_v8, 0.0 }
  0xc8   : > { %v533_v7 = vpop.f32.mrf.mxu2  ;;  %v398_v10 = vpop.f32.mrf.mxu0 }
  0xc9   : > { %v546_v9 = vadd.f32 %v533_v7, %v465_v6  ;;  %v467_v11 = vpop.f32.mrf.mxu1 }
  0xca   : > { %v468_v17 = vadd.f32 %v467_v11, %v398_v10 }
  0xcb   : > { %v557_v12 = vadd.f32 %v1037_v39, %v546_v9 }
  0xcd   : > { %v565_v14 = vmax.f32 %v557_v12, 0.0 }
  0xcf   : > { %v570_v15 = vpack.c.bf16 %v565_v14, %v564_v13 }
  0xd0   : > { %v536_v16 = vpop.f32.mrf.mxu2  ;;  %v400_v18 = vpop.f32.mrf.mxu0 }
  0xd1   : > { %657 = vmatmul.bf16.gmra.mxu3 %v570_v15  ;;  %v469_v19 = vpop.f32.mrf.mxu1  ;;  %v547_v20 = vadd.f32 %v536_v16, %v468_v17 }
  0xd2   : > { %v470_v21 = vadd.f32 %v469_v19, %v400_v18 }
  0xd3   : > { %v558_v23 = vadd.f32 %v1037_v39, %v547_v20 }
  0xd5   : > { %v566_v26 = vmax.f32 %v558_v23, 0.0 }
  0xd8   : > { %v538_v22 = vpop.f32.mrf.mxu2 }
  0xd9   : > { %v548_v24 = vadd.f32 %v538_v22, %v470_v21 }
  0xdb   : > { %v559_v25 = vadd.f32 %v1037_v39, %v548_v24 }
  0xdd   : > { %v567_v27 = vmax.f32 %v559_v25, 0.0 }
  0xdf   : > { %v571_v28 = vpack.c.bf16 %v567_v27, %v566_v26 }
  0xe1   : > { %662 = vmatmul.bf16.gmra.mxu3 %v571_v28 }
 0x12e   : > { %v648_v29 = vpop.f32.mrf.mxu0 }
 0x12f   : > { %v649_v32 = vadd.f32 %v1038_v30, %v648_v29 }
 0x136   : > { %v650_v31 = vpop.f32.mrf.mxu0 }
 0x137   : > { %v651_v33 = vadd.f32 %v1038_v30, %v650_v31 }
 0x139   : > { %v951_v34 = vpack.c.bf16 %v651_v33, %v649_v32 }
 0x13b   : > { %952 = vst [vmem:[%s273_s12] sm:$0xff] %v951_v34  }
 0x144   : > { %v653_v35 = vpop.f32.mrf.mxu3 }
 0x145   : > { %v654_v37 = vadd.f32 %v1038_v30, %v653_v35 }
 0x14c   : > { %v655_v36 = vpop.f32.mrf.mxu3 }
 0x14d   : > { %v656_v38 = vadd.f32 %v1038_v30, %v655_v36 }
 0x14f   : > { %v956_v39 = vpack.c.bf16 %v656_v38, %v654_v37 }
 0x151   : > { %968 = vst [vmem:[%s273_s12 + $0x8] sm:$0xff] %v956_v39  }
 0x154   : > { %v658_v40 = vpop.f32.mrf.mxu3 }
 0x155   : > { %v659_v42 = vadd.f32 %v1038_v30, %v658_v40 }
 0x15c   : > { %v660_v41 = vpop.f32.mrf.mxu3 }
 0x15d   : > { %v661_v43 = vadd.f32 %v1038_v30, %v660_v41 }
 0x15f   : > { %v961_v44 = vpack.c.bf16 %v661_v43, %v659_v42 }
 0x161   : > { %969 = vst [vmem:[%s273_s12 + $0x10] sm:$0xff] %v961_v44  }
 0x164   : > { %v663_v45 = vpop.f32.mrf.mxu3 }
 0x165   : > { %v664_v47 = vadd.f32 %v1038_v30, %v663_v45 }
 0x16c   : > { %v665_v46 = vpop.f32.mrf.mxu3 }
 0x16d   : > { %v666_v48 = vadd.f32 %v1038_v30, %v665_v46 }
 0x16f   : > { %v966_v49 = vpack.c.bf16 %v666_v48, %v664_v47 }
 0x171   : > { %970 = vst [vmem:[%s273_s12 + $0x18] sm:$0xff] %v966_v49  }
 0x172   : > { %1066 = shalt.err (!%p1063_p5)
}
 0x173   : > { %s1119_s28 = smov 64   ;;  %s1120_s12 = smov 4  }
 0x174   : > { %980 = dma.vmem_to_hbm [thread:$0]  (%p1196_p4), %s700_s17, 512, %s702_s18, %s685_s19, %s1119_s28, %s1119_s28, %s1120_s12  }
 0x175 PF: > { %p986_p6 = scmp.ge.s32.totalorder %s1117_s26, 2  ;;  %s716_s14 = sand.u32 1, %s1097_s21  }
 0x176   : > { %s717_s15 = scalar_lea.sflag [#allocation3], %s716_s14 }
 0x177   : > { %p983_p7 = pnand %p986_p6, %p1203_p8 }
 0x179   : > { %p984_p9 = pneg %p983_p7 }
 0x17b   : > { %1092 = dma.done.wait (%p984_p9), %s717_s15, 512  }
 0x17c   : > { %1094 = vsyncadd (%p984_p9), %s717_s15, 4294966784  ;;  %s19_s26 = sadd.s32 1, %s1117_s26   ;;  %s1332_s21 = smov %s1101_s22 }
 0x17d   : > { %p16_p10 = scmp.ge.s32.totalorder %s19_s26, 4   ;;  %s1333_s22 = smov %s1105_s23 }
 0x17e   : > { %s1334_s23 = smov %s1209_s10  ;;  %s1335_s24 = smov %s1113_s25 }
 0x17f   : > { %s1336_s25 = smov %s1338_s29  ;;  %18 = sbr.rel (!%p16_p10) target bundleno = 4 (0x4), region = 87 }
 0x184   :  { %723 = vsyncpa [#allocation3], 1 }
 0x185   :  { %725 = vsyncpa [#allocation3 + $0x1], 1 }

</bundles_post_ra>
